<compile_context>
chip_gen: v5e
topology: v5e:2x2
jax: 0.10.0
libtpu: 0.0.40
codegen_flags: <defaults>
</compile_context>

<pallas_src>
import functools

import numpy as np
import jax
import jax.numpy as jnp
from jax.experimental import pallas as pl
from jax.experimental.pallas import tpu as pltpu


# ---------------------------------------------------------------------------
# DDIM schedule buffers (mirrors DDIM_Sampler2.__init__) — pure numpy so every
# per-step coefficient becomes a trace-time Python constant (immediate).
# ---------------------------------------------------------------------------
def make_ddim_schedule_np(num_infer_steps):
    if num_infer_steps == 8:
        return np.array([1e-06, 2e-06, 1e-05, 0.0001, 0.001, 0.01, 0.1, 0.9],
                        dtype=np.float32)
    raise RuntimeError("Does not support time steps of " + str(num_infer_steps))


def make_ddim_buffers_np(num_timesteps=8):
    betas = make_ddim_schedule_np(num_timesteps)
    alphas = (1.0 - betas).astype(np.float32)
    alphas_cumprod = np.cumprod(alphas).astype(np.float32)
    alphas_cumprod_prev = np.concatenate(
        [np.array([1.0], np.float32), alphas_cumprod[:-1]])
    sqrt_alphas_cumprod_prev = np.sqrt(
        np.concatenate([np.array([1.0], np.float32), alphas_cumprod]))
    sqrt_recip_alphas_cumprod = np.sqrt(1.0 / alphas_cumprod)
    sqrt_alphas_cumprod_m1 = np.sqrt(1.0 - alphas_cumprod) * sqrt_recip_alphas_cumprod
    posterior_variance = betas * (1.0 - alphas_cumprod_prev) / (1.0 - alphas_cumprod)
    posterior_variance = np.maximum(posterior_variance, 1e-20)
    posterior_log_variance_clipped = np.log(posterior_variance)
    posterior_mean_coef1 = betas * np.sqrt(alphas_cumprod_prev) / (1.0 - alphas_cumprod)
    posterior_mean_coef2 = ((1.0 - alphas_cumprod_prev) * np.sqrt(alphas)
                            / (1.0 - alphas_cumprod))
    return dict(
        sqrt_alphas_cumprod_prev=sqrt_alphas_cumprod_prev,
        sqrt_recip_alphas_cumprod=sqrt_recip_alphas_cumprod,
        sqrt_alphas_cumprod_m1=sqrt_alphas_cumprod_m1,
        posterior_log_variance_clipped=posterior_log_variance_clipped,
        posterior_mean_coef1=posterior_mean_coef1,
        posterior_mean_coef2=posterior_mean_coef2,
    )


def make_step_coefs(buffers, num_steps):
    """Per-step scalar constants; step s corresponds to t = num_steps-1-s.
    Tuple entries: (sqrt_recip_ac, sqrt_ac_m1, coef1, coef2, noise_scale, noise_level).
    The t==0 "no noise" case is folded into noise_scale."""
    coefs = []
    for s in range(num_steps):
        t = num_steps - 1 - s
        noise_scale = (float(np.exp(0.5 * buffers["posterior_log_variance_clipped"][t]))
                       if t > 0 else 0.0)
        coefs.append((
            float(buffers["sqrt_recip_alphas_cumprod"][t]),
            float(buffers["sqrt_alphas_cumprod_m1"][t]),
            float(buffers["posterior_mean_coef1"][t]),
            float(buffers["posterior_mean_coef2"][t]),
            noise_scale,
            float(buffers["sqrt_alphas_cumprod_prev"][t + 1]),
        ))
    return tuple(coefs)


# ---------------------------------------------------------------------------
# Fused Pallas kernel: all num_steps DDIM sampler steps (the module's forward,
# applied num_steps times) unrolled inside a single no-grid call.  Everything
# is VMEM-resident; y is carried in vregs across the unrolled loop.
# ---------------------------------------------------------------------------
def ddim_fused_kernel(y_ref,        # VMEM (B, L)        f32  initial sample
                      ydown_ref,    # VMEM (B, L)        f32  conditioning
                      noise_ref,    # VMEM (S, B, L)     f32  pre-sampled posterior noise
                      w1_ref,       # VMEM (L, H)        bf16 eps-net input proj (y)
                      w2_ref,       # VMEM (L, H)        bf16 eps-net input proj (y_down)
                      w3_ref,       # VMEM (H, L)        bf16 eps-net output proj
                      b_ref,        # VMEM (1, H)        f32  eps-net bias
                      out_ref,      # VMEM (B, L)        f32  final sample
                      *, step_coefs, clip_denoised):
    y = y_ref[...]
    b = b_ref[...]

    # Step-invariant conditioning projection, hoisted out of the step loop
    # (y_down never changes across steps).
    yd_proj = jnp.dot(ydown_ref[...].astype(jnp.bfloat16), w2_ref[...],
                      preferred_element_type=jnp.float32)

    # Statically unrolled reverse-diffusion loop: t = num_steps-1 .. 0.
    for s, (c_recip, c_m1, c1, c2, c_noise, noise_level) in enumerate(step_coefs):
        # --- synthetic eps-predictor (external `model` in PyTorch) ---
        h = jnp.tanh(
            jnp.dot(y.astype(jnp.bfloat16), w1_ref[...],
                    preferred_element_type=jnp.float32)
            + yd_proj + noise_level * b)
        eps_recon = jnp.dot(h.astype(jnp.bfloat16), w3_ref[...],
                            preferred_element_type=jnp.float32)

        # --- predict_start_from_noise ---
        y_recon = c_recip * y - c_m1 * eps_recon

        # --- optional clamp(-1, 1): specialized at trace time ---
        if clip_denoised:
            y_recon = jnp.clip(y_recon, -1.0, 1.0)

        # --- q_posterior mean + posterior noise (scale is 0 for the t==0 step) ---
        mean = c1 * y_recon + c2 * y
        y = mean + noise_ref[s] * c_noise

    out_ref[...] = y


def ddim_sample_loop(y, y_down, noise_stack, params, buffers, clip_denoised=False,
                     time=None):
    """Runs the full reverse-diffusion loop (num_steps applications of the module's
    forward / compute_inverse_dynamincs) in a single fused pallas_call."""
    del time  # TODO(synk): `time` is forwarded to the external model in PyTorch;
              # the synthetic eps-model here does not consume it.
    num_steps, B, L = noise_stack.shape
    H = params["w3"].shape[0]

    step_coefs = make_step_coefs(buffers, num_steps)

    # bf16 MXU operands, f32 accumulation; elementwise DDIM math stays f32.
    w1 = params["w1"].astype(jnp.bfloat16)
    w2 = params["w2"].astype(jnp.bfloat16)
    w3 = params["w3"].astype(jnp.bfloat16)

    kernel = functools.partial(ddim_fused_kernel,
                               step_coefs=step_coefs,
                               clip_denoised=clip_denoised)

    vmem = pltpu.MemorySpace.VMEM
    return pl.pallas_call(
        kernel,
        out_shape=jax.ShapeDtypeStruct((B, L), jnp.float32),
        in_specs=[pl.BlockSpec(memory_space=vmem) for _ in range(7)],
        out_specs=pl.BlockSpec(memory_space=vmem),
    )(y, y_down, noise_stack, w1, w2, w3, params["b"])


# ---------------------------------------------------------------------------
# Pure-JAX reference (same math, no Pallas): num_steps calls of the module's
# forward step, chaining y — correctness check for the fused kernel.
# ---------------------------------------------------------------------------
def ddim_sample_loop_ref(y, y_down, noise_stack, params, buffers,
                         clip_denoised=False):
    num_steps = noise_stack.shape[0]
    step_coefs = make_step_coefs(buffers, num_steps)
    w1 = params["w1"].astype(jnp.bfloat16)
    w2 = params["w2"].astype(jnp.bfloat16)
    w3 = params["w3"].astype(jnp.bfloat16)
    yd_proj = jnp.dot(y_down.astype(jnp.bfloat16), w2,
                      preferred_element_type=jnp.float32)
    for s, (c_recip, c_m1, c1, c2, c_noise, noise_level) in enumerate(step_coefs):
        h = jnp.tanh(jnp.dot(y.astype(jnp.bfloat16), w1,
                             preferred_element_type=jnp.float32)
                     + yd_proj + noise_level * params["b"])
        eps_recon = jnp.dot(h.astype(jnp.bfloat16), w3,
                            preferred_element_type=jnp.float32)
        y_recon = c_recip * y - c_m1 * eps_recon
        if clip_denoised:
            y_recon = jnp.clip(y_recon, -1.0, 1.0)
        mean = c1 * y_recon + c2 * y
        y = mean + noise_stack[s] * c_noise
    return y


# ---------------------------------------------------------------------------
if __name__ == "__main__":
    NUM_STEPS = 8
    B, L, H = 8, 128, 128   # one (8,128) vreg tile of activations

    key = jax.random.PRNGKey(0)
    k_y, k_yd, k_n, k_w1, k_w2, k_w3, k_b = jax.random.split(key, 7)

    y = jax.random.normal(k_y, (B, L), dtype=jnp.float32)
    y_down = jax.random.normal(k_yd, (B, L), dtype=jnp.float32)
    # Pre-sampled posterior noise for every sampler step (torch.randn_like
    # equivalent, drawn up-front so the kernel is deterministic).
    noise_stack = jax.random.normal(k_n, (NUM_STEPS, B, L), dtype=jnp.float32)

    params = {
        "w1": jax.random.normal(k_w1, (L, H), dtype=jnp.float32) * 0.05,
        "w2": jax.random.normal(k_w2, (L, H), dtype=jnp.float32) * 0.05,
        "w3": jax.random.normal(k_w3, (H, L), dtype=jnp.float32) * 0.05,
        "b": jax.random.normal(k_b, (1, H), dtype=jnp.float32) * 0.1,
    }

    buffers = make_ddim_buffers_np(num_timesteps=NUM_STEPS)
    clip_denoised = True   # module default clip_sample=True

    out = ddim_sample_loop(y, y_down, noise_stack, params, buffers,
                           clip_denoised=clip_denoised)
    out = jax.block_until_ready(out)

    ref = ddim_sample_loop_ref(y, y_down, noise_stack, params, buffers,
                               clip_denoised=clip_denoised)
    assert out.shape == (B, L) and out.dtype == jnp.float32
    assert jnp.allclose(out, ref, rtol=1e-3, atol=1e-3), "mismatch vs reference"

    print("KERNEL_OK")
</pallas_src>

<mosaic_0001>
module attributes {stable_mosaic.version = 11 : i64} {
  func.func @ddim_fused_kernel(%arg0: memref<8x128xf32, #tpu.memory_space<vmem>>, %arg1: memref<8x128xf32, #tpu.memory_space<vmem>>, %arg2: memref<8x8x128xf32, #tpu.memory_space<vmem>>, %arg3: memref<128x128xbf16, #tpu.memory_space<vmem>>, %arg4: memref<128x128xbf16, #tpu.memory_space<vmem>>, %arg5: memref<128x128xbf16, #tpu.memory_space<vmem>>, %arg6: memref<1x128xf32, #tpu.memory_space<vmem>>, %arg7: memref<8x128xf32, #tpu.memory_space<vmem>>) attributes {dimension_semantics = [], scalar_prefetch = 0 : i64, scratch_operands = 0 : i64, tpu.core_type = #tpu.core_type<tc>} {
    %c0 = arith.constant 0 : index
    %c0_0 = arith.constant 0 : index
    %0 = vector.load %arg0[%c0, %c0_0] : memref<8x128xf32, #tpu.memory_space<vmem>>, vector<8x128xf32>
    %c0_1 = arith.constant 0 : index
    %c0_2 = arith.constant 0 : index
    %1 = vector.load %arg6[%c0_1, %c0_2] : memref<1x128xf32, #tpu.memory_space<vmem>>, vector<1x128xf32>
    %c0_3 = arith.constant 0 : index
    %c0_4 = arith.constant 0 : index
    %2 = vector.load %arg1[%c0_3, %c0_4] : memref<8x128xf32, #tpu.memory_space<vmem>>, vector<8x128xf32>
    %3 = arith.truncf %2 : vector<8x128xf32> to vector<8x128xbf16>
    %c0_5 = arith.constant 0 : index
    %c0_6 = arith.constant 0 : index
    %4 = vector.load %arg4[%c0_5, %c0_6] : memref<128x128xbf16, #tpu.memory_space<vmem>>, vector<128x128xbf16>
    %cst = arith.constant dense<0.000000e+00> : vector<8x128xf32>
    %5 = tpu.matmul %3, %4, %cst {dimension_numbers = #tpu.dot_dimension_numbers<[1], [0], [0], [1], [0, 0, 1, 1], [], []>} : vector<8x128xbf16>, vector<128x128xbf16>, vector<8x128xf32> -> vector<8x128xf32>
    %6 = arith.truncf %0 : vector<8x128xf32> to vector<8x128xbf16>
    %c0_7 = arith.constant 0 : index
    %c0_8 = arith.constant 0 : index
    %7 = vector.load %arg3[%c0_7, %c0_8] : memref<128x128xbf16, #tpu.memory_space<vmem>>, vector<128x128xbf16>
    %cst_9 = arith.constant dense<0.000000e+00> : vector<8x128xf32>
    %8 = tpu.matmul %6, %7, %cst_9 {dimension_numbers = #tpu.dot_dimension_numbers<[1], [0], [0], [1], [0, 0, 1, 1], [], []>} : vector<8x128xbf16>, vector<128x128xbf16>, vector<8x128xf32> -> vector<8x128xf32>
    %9 = arith.addf %8, %5 : vector<8x128xf32>
    %cst_10 = arith.constant 0.298330128 : f32
    %10 = vector.broadcast %cst_10 : f32 to vector<1x128xf32>
    %11 = arith.mulf %10, %1 : vector<1x128xf32>
    %12 = vector.broadcast %11 : vector<1x128xf32> to vector<8x128xf32>
    %13 = arith.addf %9, %12 : vector<8x128xf32>
    %14 = math.tanh %13 : vector<8x128xf32>
    %15 = arith.truncf %14 : vector<8x128xf32> to vector<8x128xbf16>
    %c0_11 = arith.constant 0 : index
    %c0_12 = arith.constant 0 : index
    %16 = vector.load %arg5[%c0_11, %c0_12] : memref<128x128xbf16, #tpu.memory_space<vmem>>, vector<128x128xbf16>
    %cst_13 = arith.constant dense<0.000000e+00> : vector<8x128xf32>
    %17 = tpu.matmul %15, %16, %cst_13 {dimension_numbers = #tpu.dot_dimension_numbers<[1], [0], [0], [1], [0, 0, 1, 1], [], []>} : vector<8x128xbf16>, vector<128x128xbf16>, vector<8x128xf32> -> vector<8x128xf32>
    %cst_14 = arith.constant 3.35199142 : f32
    %18 = vector.broadcast %cst_14 : f32 to vector<8x128xf32>
    %19 = arith.mulf %18, %0 : vector<8x128xf32>
    %cst_15 = arith.constant 3.19935107 : f32
    %20 = vector.broadcast %cst_15 : f32 to vector<8x128xf32>
    %21 = arith.mulf %20, %17 : vector<8x128xf32>
    %22 = arith.subf %19, %21 : vector<8x128xf32>
    %cst_16 = arith.constant -1.000000e+00 : f32
    %cst_17 = arith.constant 1.000000e+00 : f32
    %23 = vector.broadcast %cst_16 : f32 to vector<8x128xf32>
    %24 = arith.maximumf %23, %22 : vector<8x128xf32>
    %25 = vector.broadcast %cst_17 : f32 to vector<8x128xf32>
    %26 = arith.minimumf %25, %24 : vector<8x128xf32>
    %cst_18 = arith.constant 0.932012259 : f32
    %27 = vector.broadcast %cst_18 : f32 to vector<8x128xf32>
    %28 = arith.mulf %27, %26 : vector<8x128xf32>
    %cst_19 = arith.constant 0.038180504 : f32
    %29 = vector.broadcast %cst_19 : f32 to vector<8x128xf32>
    %30 = arith.mulf %29, %0 : vector<8x128xf32>
    %31 = arith.addf %28, %30 : vector<8x128xf32>
    %c0_20 = arith.constant 0 : index
    %c0_21 = arith.constant 0 : index
    %c0_22 = arith.constant 0 : index
    %32 = vector.load %arg2[%c0_20, %c0_21, %c0_22] : memref<8x8x128xf32, #tpu.memory_space<vmem>>, vector<1x8x128xf32>
    %33 = vector.shape_cast %32 : vector<1x8x128xf32> to vector<8x128xf32>
    %cst_23 = arith.constant 0.32964164 : f32
    %34 = vector.broadcast %cst_23 : f32 to vector<8x128xf32>
    %35 = arith.mulf %33, %34 : vector<8x128xf32>
    %36 = arith.addf %31, %35 : vector<8x128xf32>
    %37 = arith.truncf %36 : vector<8x128xf32> to vector<8x128xbf16>
    %c0_24 = arith.constant 0 : index
    %c0_25 = arith.constant 0 : index
    %38 = vector.load %arg3[%c0_24, %c0_25] : memref<128x128xbf16, #tpu.memory_space<vmem>>, vector<128x128xbf16>
    %cst_26 = arith.constant dense<0.000000e+00> : vector<8x128xf32>
    %39 = tpu.matmul %37, %38, %cst_26 {dimension_numbers = #tpu.dot_dimension_numbers<[1], [0], [0], [1], [0, 0, 1, 1], [], []>} : vector<8x128xbf16>, vector<128x128xbf16>, vector<8x128xf32> -> vector<8x128xf32>
    %40 = arith.addf %39, %5 : vector<8x128xf32>
    %cst_27 = arith.constant 0.943402588 : f32
    %41 = vector.broadcast %cst_27 : f32 to vector<1x128xf32>
    %42 = arith.mulf %41, %1 : vector<1x128xf32>
    %43 = vector.broadcast %42 : vector<1x128xf32> to vector<8x128xf32>
    %44 = arith.addf %40, %43 : vector<8x128xf32>
    %45 = math.tanh %44 : vector<8x128xf32>
    %46 = arith.truncf %45 : vector<8x128xf32> to vector<8x128xbf16>
    %c0_28 = arith.constant 0 : index
    %c0_29 = arith.constant 0 : index
    %47 = vector.load %arg5[%c0_28, %c0_29] : memref<128x128xbf16, #tpu.memory_space<vmem>>, vector<128x128xbf16>
    %cst_30 = arith.constant dense<0.000000e+00> : vector<8x128xf32>
    %48 = tpu.matmul %46, %47, %cst_30 {dimension_numbers = #tpu.dot_dimension_numbers<[1], [0], [0], [1], [0, 0, 1, 1], [], []>} : vector<8x128xbf16>, vector<128x128xbf16>, vector<8x128xf32> -> vector<8x128xf32>
    %cst_31 = arith.constant 1.05999291 : f32
    %49 = vector.broadcast %cst_31 : f32 to vector<8x128xf32>
    %50 = arith.mulf %49, %36 : vector<8x128xf32>
    %cst_32 = arith.constant 0.351546466 : f32
    %51 = vector.broadcast %cst_32 : f32 to vector<8x128xf32>
    %52 = arith.mulf %51, %48 : vector<8x128xf32>
    %53 = arith.subf %50, %52 : vector<8x128xf32>
    %cst_33 = arith.constant -1.000000e+00 : f32
    %cst_34 = arith.constant 1.000000e+00 : f32
    %54 = vector.broadcast %cst_33 : f32 to vector<8x128xf32>
    %55 = arith.maximumf %54, %53 : vector<8x128xf32>
    %56 = vector.broadcast %cst_34 : f32 to vector<8x128xf32>
    %57 = arith.minimumf %56, %55 : vector<8x128xf32>
    %cst_35 = arith.constant 0.904099583 : f32
    %58 = vector.broadcast %cst_35 : f32 to vector<8x128xf32>
    %59 = arith.mulf %58, %57 : vector<8x128xf32>
    %cst_36 = arith.constant 0.0957534387 : f32
    %60 = vector.broadcast %cst_36 : f32 to vector<8x128xf32>
    %61 = arith.mulf %60, %36 : vector<8x128xf32>
    %62 = arith.addf %59, %61 : vector<8x128xf32>
    %c1 = arith.constant 1 : index
    %c0_37 = arith.constant 0 : index
    %c0_38 = arith.constant 0 : index
    %63 = vector.load %arg2[%c1, %c0_37, %c0_38] : memref<8x8x128xf32, #tpu.memory_space<vmem>>, vector<1x8x128xf32>
    %64 = vector.shape_cast %63 : vector<1x8x128xf32> to vector<8x128xf32>
    %cst_39 = arith.constant 0.100465417 : f32
    %65 = vector.broadcast %cst_39 : f32 to vector<8x128xf32>
    %66 = arith.mulf %64, %65 : vector<8x128xf32>
    %67 = arith.addf %62, %66 : vector<8x128xf32>
    %68 = arith.truncf %67 : vector<8x128xf32> to vector<8x128xbf16>
    %c0_40 = arith.constant 0 : index
    %c0_41 = arith.constant 0 : index
    %69 = vector.load %arg3[%c0_40, %c0_41] : memref<128x128xbf16, #tpu.memory_space<vmem>>, vector<128x128xbf16>
    %cst_42 = arith.constant dense<0.000000e+00> : vector<8x128xf32>
    %70 = tpu.matmul %68, %69, %cst_42 {dimension_numbers = #tpu.dot_dimension_numbers<[1], [0], [0], [1], [0, 0, 1, 1], [], []>} : vector<8x128xbf16>, vector<128x128xbf16>, vector<8x128xf32> -> vector<8x128xf32>
    %71 = arith.addf %70, %5 : vector<8x128xf32>
    %cst_43 = arith.constant 0.994433641 : f32
    %72 = vector.broadcast %cst_43 : f32 to vector<1x128xf32>
    %73 = arith.mulf %72, %1 : vector<1x128xf32>
    %74 = vector.broadcast %73 : vector<1x128xf32> to vector<8x128xf32>
    %75 = arith.addf %71, %74 : vector<8x128xf32>
    %76 = math.tanh %75 : vector<8x128xf32>
    %77 = arith.truncf %76 : vector<8x128xf32> to vector<8x128xbf16>
    %c0_44 = arith.constant 0 : index
    %c0_45 = arith.constant 0 : index
    %78 = vector.load %arg5[%c0_44, %c0_45] : memref<128x128xbf16, #tpu.memory_space<vmem>>, vector<128x128xbf16>
    %cst_46 = arith.constant dense<0.000000e+00> : vector<8x128xf32>
    %79 = tpu.matmul %77, %78, %cst_46 {dimension_numbers = #tpu.dot_dimension_numbers<[1], [0], [0], [1], [0, 0, 1, 1], [], []>} : vector<8x128xbf16>, vector<128x128xbf16>, vector<8x128xf32> -> vector<8x128xf32>
    %cst_47 = arith.constant 1.00559759 : f32
    %80 = vector.broadcast %cst_47 : f32 to vector<8x128xf32>
    %81 = arith.mulf %80, %67 : vector<8x128xf32>
    %cst_48 = arith.constant 0.105954781 : f32
    %82 = vector.broadcast %cst_48 : f32 to vector<8x128xf32>
    %83 = arith.mulf %82, %79 : vector<8x128xf32>
    %84 = arith.subf %81, %83 : vector<8x128xf32>
    %cst_49 = arith.constant -1.000000e+00 : f32
    %cst_50 = arith.constant 1.000000e+00 : f32
    %85 = vector.broadcast %cst_49 : f32 to vector<8x128xf32>
    %86 = arith.maximumf %85, %84 : vector<8x128xf32>
    %87 = vector.broadcast %cst_50 : f32 to vector<8x128xf32>
    %88 = arith.minimumf %87, %86 : vector<8x128xf32>
    %cst_51 = arith.constant 0.900254845 : f32
    %89 = vector.broadcast %cst_51 : f32 to vector<8x128xf32>
    %90 = arith.mulf %89, %88 : vector<8x128xf32>
    %cst_52 = arith.constant 0.0997460708 : f32
    %91 = vector.broadcast %cst_52 : f32 to vector<8x128xf32>
    %92 = arith.mulf %91, %67 : vector<8x128xf32>
    %93 = arith.addf %90, %92 : vector<8x128xf32>
    %c2 = arith.constant 2 : index
    %c0_53 = arith.constant 0 : index
    %c0_54 = arith.constant 0 : index
    %94 = vector.load %arg2[%c2, %c0_53, %c0_54] : memref<8x8x128xf32, #tpu.memory_space<vmem>>, vector<1x8x128xf32>
    %95 = vector.shape_cast %94 : vector<1x8x128xf32> to vector<8x128xf32>
    %cst_55 = arith.constant 0.0316620581 : f32
    %96 = vector.broadcast %cst_55 : f32 to vector<8x128xf32>
    %97 = arith.mulf %95, %96 : vector<8x128xf32>
    %98 = arith.addf %93, %97 : vector<8x128xf32>
    %99 = arith.truncf %98 : vector<8x128xf32> to vector<8x128xbf16>
    %c0_56 = arith.constant 0 : index
    %c0_57 = arith.constant 0 : index
    %100 = vector.load %arg3[%c0_56, %c0_57] : memref<128x128xbf16, #tpu.memory_space<vmem>>, vector<128x128xbf16>
    %cst_58 = arith.constant dense<0.000000e+00> : vector<8x128xf32>
    %101 = tpu.matmul %99, %100, %cst_58 {dimension_numbers = #tpu.dot_dimension_numbers<[1], [0], [0], [1], [0, 0, 1, 1], [], []>} : vector<8x128xbf16>, vector<128x128xbf16>, vector<8x128xf32> -> vector<8x128xf32>
    %102 = arith.addf %101, %5 : vector<8x128xf32>
    %cst_59 = arith.constant 0.999443352 : f32
    %103 = vector.broadcast %cst_59 : f32 to vector<1x128xf32>
    %104 = arith.mulf %103, %1 : vector<1x128xf32>
    %105 = vector.broadcast %104 : vector<1x128xf32> to vector<8x128xf32>
    %106 = arith.addf %102, %105 : vector<8x128xf32>
    %107 = math.tanh %106 : vector<8x128xf32>
    %108 = arith.truncf %107 : vector<8x128xf32> to vector<8x128xbf16>
    %c0_60 = arith.constant 0 : index
    %c0_61 = arith.constant 0 : index
    %109 = vector.load %arg5[%c0_60, %c0_61] : memref<128x128xbf16, #tpu.memory_space<vmem>>, vector<128x128xbf16>
    %cst_62 = arith.constant dense<0.000000e+00> : vector<8x128xf32>
    %110 = tpu.matmul %108, %109, %cst_62 {dimension_numbers = #tpu.dot_dimension_numbers<[1], [0], [0], [1], [0, 0, 1, 1], [], []>} : vector<8x128xbf16>, vector<128x128xbf16>, vector<8x128xf32> -> vector<8x128xf32>
    %cst_63 = arith.constant 1.00055695 : f32
    %111 = vector.broadcast %cst_63 : f32 to vector<8x128xf32>
    %112 = arith.mulf %111, %98 : vector<8x128xf32>
    %cst_64 = arith.constant 0.0333793052 : f32
    %113 = vector.broadcast %cst_64 : f32 to vector<8x128xf32>
    %114 = arith.mulf %113, %110 : vector<8x128xf32>
    %115 = arith.subf %112, %114 : vector<8x128xf32>
    %cst_65 = arith.constant -1.000000e+00 : f32
    %cst_66 = arith.constant 1.000000e+00 : f32
    %116 = vector.broadcast %cst_65 : f32 to vector<8x128xf32>
    %117 = arith.maximumf %116, %115 : vector<8x128xf32>
    %118 = vector.broadcast %cst_66 : f32 to vector<8x128xf32>
    %119 = arith.minimumf %118, %117 : vector<8x128xf32>
    %cst_67 = arith.constant 0.898471891 : f32
    %120 = vector.broadcast %cst_67 : f32 to vector<8x128xf32>
    %121 = arith.mulf %120, %119 : vector<8x128xf32>
    %cst_68 = arith.constant 0.101545162 : f32
    %122 = vector.broadcast %cst_68 : f32 to vector<8x128xf32>
    %123 = arith.mulf %122, %98 : vector<8x128xf32>
    %124 = arith.addf %121, %123 : vector<8x128xf32>
    %c3 = arith.constant 3 : index
    %c0_69 = arith.constant 0 : index
    %c0_70 = arith.constant 0 : index
    %125 = vector.load %arg2[%c3, %c0_69, %c0_70] : memref<8x8x128xf32, #tpu.memory_space<vmem>>, vector<1x8x128xf32>
    %126 = vector.shape_cast %125 : vector<1x8x128xf32> to vector<8x128xf32>
    %cst_71 = arith.constant 0.0100794835 : f32
    %127 = vector.broadcast %cst_71 : f32 to vector<8x128xf32>
    %128 = arith.mulf %126, %127 : vector<8x128xf32>
    %129 = arith.addf %124, %128 : vector<8x128xf32>
    %130 = arith.truncf %129 : vector<8x128xf32> to vector<8x128xbf16>
    %c0_72 = arith.constant 0 : index
    %c0_73 = arith.constant 0 : index
    %131 = vector.load %arg3[%c0_72, %c0_73] : memref<128x128xbf16, #tpu.memory_space<vmem>>, vector<128x128xbf16>
    %cst_74 = arith.constant dense<0.000000e+00> : vector<8x128xf32>
    %132 = tpu.matmul %130, %131, %cst_74 {dimension_numbers = #tpu.dot_dimension_numbers<[1], [0], [0], [1], [0, 0, 1, 1], [], []>} : vector<8x128xbf16>, vector<128x128xbf16>, vector<8x128xf32> -> vector<8x128xf32>
    %133 = arith.addf %132, %5 : vector<8x128xf32>
    %cst_75 = arith.constant 0.999943435 : f32
    %134 = vector.broadcast %cst_75 : f32 to vector<1x128xf32>
    %135 = arith.mulf %134, %1 : vector<1x128xf32>
    %136 = vector.broadcast %135 : vector<1x128xf32> to vector<8x128xf32>
    %137 = arith.addf %133, %136 : vector<8x128xf32>
    %138 = math.tanh %137 : vector<8x128xf32>
    %139 = arith.truncf %138 : vector<8x128xf32> to vector<8x128xbf16>
    %c0_76 = arith.constant 0 : index
    %c0_77 = arith.constant 0 : index
    %140 = vector.load %arg5[%c0_76, %c0_77] : memref<128x128xbf16, #tpu.memory_space<vmem>>, vector<128x128xbf16>
    %cst_78 = arith.constant dense<0.000000e+00> : vector<8x128xf32>
    %141 = tpu.matmul %139, %140, %cst_78 {dimension_numbers = #tpu.dot_dimension_numbers<[1], [0], [0], [1], [0, 0, 1, 1], [], []>} : vector<8x128xbf16>, vector<128x128xbf16>, vector<8x128xf32> -> vector<8x128xf32>
    %cst_79 = arith.constant 1.00005651 : f32
    %142 = vector.broadcast %cst_79 : f32 to vector<8x128xf32>
    %143 = arith.mulf %142, %129 : vector<8x128xf32>
    %cst_80 = arith.constant 0.0106340386 : f32
    %144 = vector.broadcast %cst_80 : f32 to vector<8x128xf32>
    %145 = arith.mulf %144, %141 : vector<8x128xf32>
    %146 = arith.subf %143, %145 : vector<8x128xf32>
    %cst_81 = arith.constant -1.000000e+00 : f32
    %cst_82 = arith.constant 1.000000e+00 : f32
    %147 = vector.broadcast %cst_81 : f32 to vector<8x128xf32>
    %148 = arith.maximumf %147, %146 : vector<8x128xf32>
    %149 = vector.broadcast %cst_82 : f32 to vector<8x128xf32>
    %150 = arith.minimumf %149, %148 : vector<8x128xf32>
    %cst_83 = arith.constant 0.884401977 : f32
    %151 = vector.broadcast %cst_83 : f32 to vector<8x128xf32>
    %152 = arith.mulf %151, %150 : vector<8x128xf32>
    %cst_84 = arith.constant 0.115439668 : f32
    %153 = vector.broadcast %cst_84 : f32 to vector<8x128xf32>
    %154 = arith.mulf %153, %129 : vector<8x128xf32>
    %155 = arith.addf %152, %154 : vector<8x128xf32>
    %c4 = arith.constant 4 : index
    %c0_85 = arith.constant 0 : index
    %c0_86 = arith.constant 0 : index
    %156 = vector.load %arg2[%c4, %c0_85, %c0_86] : memref<8x8x128xf32, #tpu.memory_space<vmem>>, vector<1x8x128xf32>
    %157 = vector.shape_cast %156 : vector<1x8x128xf32> to vector<8x128xf32>
    %cst_87 = arith.constant 0.00339772576 : f32
    %158 = vector.broadcast %cst_87 : f32 to vector<8x128xf32>
    %159 = arith.mulf %157, %158 : vector<8x128xf32>
    %160 = arith.addf %155, %159 : vector<8x128xf32>
    %161 = arith.truncf %160 : vector<8x128xf32> to vector<8x128xbf16>
    %c0_88 = arith.constant 0 : index
    %c0_89 = arith.constant 0 : index
    %162 = vector.load %arg3[%c0_88, %c0_89] : memref<128x128xbf16, #tpu.memory_space<vmem>>, vector<128x128xbf16>
    %cst_90 = arith.constant dense<0.000000e+00> : vector<8x128xf32>
    %163 = tpu.matmul %161, %162, %cst_90 {dimension_numbers = #tpu.dot_dimension_numbers<[1], [0], [0], [1], [0, 0, 1, 1], [], []>} : vector<8x128xbf16>, vector<128x128xbf16>, vector<8x128xf32> -> vector<8x128xf32>
    %164 = arith.addf %163, %5 : vector<8x128xf32>
    %cst_91 = arith.constant 0.999993443 : f32
    %165 = vector.broadcast %cst_91 : f32 to vector<1x128xf32>
    %166 = arith.mulf %165, %1 : vector<1x128xf32>
    %167 = vector.broadcast %166 : vector<1x128xf32> to vector<8x128xf32>
    %168 = arith.addf %164, %167 : vector<8x128xf32>
    %169 = math.tanh %168 : vector<8x128xf32>
    %170 = arith.truncf %169 : vector<8x128xf32> to vector<8x128xbf16>
    %c0_92 = arith.constant 0 : index
    %c0_93 = arith.constant 0 : index
    %171 = vector.load %arg5[%c0_92, %c0_93] : memref<128x128xbf16, #tpu.memory_space<vmem>>, vector<128x128xbf16>
    %cst_94 = arith.constant dense<0.000000e+00> : vector<8x128xf32>
    %172 = tpu.matmul %170, %171, %cst_94 {dimension_numbers = #tpu.dot_dimension_numbers<[1], [0], [0], [1], [0, 0, 1, 1], [], []>} : vector<8x128xbf16>, vector<128x128xbf16>, vector<8x128xf32> -> vector<8x128xf32>
    %cst_95 = arith.constant 1.00000656 : f32
    %173 = vector.broadcast %cst_95 : f32 to vector<8x128xf32>
    %174 = arith.mulf %173, %160 : vector<8x128xf32>
    %cst_96 = arith.constant 0.00361297512 : f32
    %175 = vector.broadcast %cst_96 : f32 to vector<8x128xf32>
    %176 = arith.mulf %175, %172 : vector<8x128xf32>
    %177 = arith.subf %174, %176 : vector<8x128xf32>
    %cst_97 = arith.constant -1.000000e+00 : f32
    %cst_98 = arith.constant 1.000000e+00 : f32
    %178 = vector.broadcast %cst_97 : f32 to vector<8x128xf32>
    %179 = arith.maximumf %178, %177 : vector<8x128xf32>
    %180 = vector.broadcast %cst_98 : f32 to vector<8x128xf32>
    %181 = arith.minimumf %180, %179 : vector<8x128xf32>
    %cst_99 = arith.constant 0.76608169 : f32
    %182 = vector.broadcast %cst_99 : f32 to vector<8x128xf32>
    %183 = arith.mulf %182, %181 : vector<8x128xf32>
    %cst_100 = arith.constant 0.232875541 : f32
    %184 = vector.broadcast %cst_100 : f32 to vector<8x128xf32>
    %185 = arith.mulf %184, %160 : vector<8x128xf32>
    %186 = arith.addf %183, %185 : vector<8x128xf32>
    %c5 = arith.constant 5 : index
    %c0_101 = arith.constant 0 : index
    %c0_102 = arith.constant 0 : index
    %187 = vector.load %arg2[%c5, %c0_101, %c0_102] : memref<8x8x128xf32, #tpu.memory_space<vmem>>, vector<1x8x128xf32>
    %188 = vector.shape_cast %187 : vector<1x8x128xf32> to vector<8x128xf32>
    %cst_103 = arith.constant 0.00152602955 : f32
    %189 = vector.broadcast %cst_103 : f32 to vector<8x128xf32>
    %190 = arith.mulf %188, %189 : vector<8x128xf32>
    %191 = arith.addf %186, %190 : vector<8x128xf32>
    %192 = arith.truncf %191 : vector<8x128xf32> to vector<8x128xbf16>
    %c0_104 = arith.constant 0 : index
    %c0_105 = arith.constant 0 : index
    %193 = vector.load %arg3[%c0_104, %c0_105] : memref<128x128xbf16, #tpu.memory_space<vmem>>, vector<128x128xbf16>
    %cst_106 = arith.constant dense<0.000000e+00> : vector<8x128xf32>
    %194 = tpu.matmul %192, %193, %cst_106 {dimension_numbers = #tpu.dot_dimension_numbers<[1], [0], [0], [1], [0, 0, 1, 1], [], []>} : vector<8x128xbf16>, vector<128x128xbf16>, vector<8x128xf32> -> vector<8x128xf32>
    %195 = arith.addf %194, %5 : vector<8x128xf32>
    %cst_107 = arith.constant 0.99999845 : f32
    %196 = vector.broadcast %cst_107 : f32 to vector<1x128xf32>
    %197 = arith.mulf %196, %1 : vector<1x128xf32>
    %198 = vector.broadcast %197 : vector<1x128xf32> to vector<8x128xf32>
    %199 = arith.addf %195, %198 : vector<8x128xf32>
    %200 = math.tanh %199 : vector<8x128xf32>
    %201 = arith.truncf %200 : vector<8x128xf32> to vector<8x128xbf16>
    %c0_108 = arith.constant 0 : index
    %c0_109 = arith.constant 0 : index
    %202 = vector.load %arg5[%c0_108, %c0_109] : memref<128x128xbf16, #tpu.memory_space<vmem>>, vector<128x128xbf16>
    %cst_110 = arith.constant dense<0.000000e+00> : vector<8x128xf32>
    %203 = tpu.matmul %201, %202, %cst_110 {dimension_numbers = #tpu.dot_dimension_numbers<[1], [0], [0], [1], [0, 0, 1, 1], [], []>} : vector<8x128xbf16>, vector<128x128xbf16>, vector<8x128xf32> -> vector<8x128xf32>
    %cst_111 = arith.constant 1.00000155 : f32
    %204 = vector.broadcast %cst_111 : f32 to vector<8x128xf32>
    %205 = arith.mulf %204, %191 : vector<8x128xf32>
    %cst_112 = arith.constant 0.00174351549 : f32
    %206 = vector.broadcast %cst_112 : f32 to vector<8x128xf32>
    %207 = arith.mulf %206, %203 : vector<8x128xf32>
    %208 = arith.subf %205, %207 : vector<8x128xf32>
    %cst_113 = arith.constant -1.000000e+00 : f32
    %cst_114 = arith.constant 1.000000e+00 : f32
    %209 = vector.broadcast %cst_113 : f32 to vector<8x128xf32>
    %210 = arith.maximumf %209, %208 : vector<8x128xf32>
    %211 = vector.broadcast %cst_114 : f32 to vector<8x128xf32>
    %212 = arith.minimumf %211, %210 : vector<8x128xf32>
    %cst_115 = arith.constant 0.657929659 : f32
    %213 = vector.broadcast %cst_115 : f32 to vector<8x128xf32>
    %214 = arith.mulf %213, %212 : vector<8x128xf32>
    %cst_116 = arith.constant 3.333330e-01 : f32
    %215 = vector.broadcast %cst_116 : f32 to vector<8x128xf32>
    %216 = arith.mulf %215, %191 : vector<8x128xf32>
    %217 = arith.addf %214, %216 : vector<8x128xf32>
    %c6 = arith.constant 6 : index
    %c0_117 = arith.constant 0 : index
    %c0_118 = arith.constant 0 : index
    %218 = vector.load %arg2[%c6, %c0_117, %c0_118] : memref<8x8x128xf32, #tpu.memory_space<vmem>>, vector<1x8x128xf32>
    %219 = vector.shape_cast %218 : vector<1x8x128xf32> to vector<8x128xf32>
    %cst_119 = arith.constant 8.16496497E-4 : f32
    %220 = vector.broadcast %cst_119 : f32 to vector<8x128xf32>
    %221 = arith.mulf %219, %220 : vector<8x128xf32>
    %222 = arith.addf %217, %221 : vector<8x128xf32>
    %223 = arith.truncf %222 : vector<8x128xf32> to vector<8x128xbf16>
    %c0_120 = arith.constant 0 : index
    %c0_121 = arith.constant 0 : index
    %224 = vector.load %arg3[%c0_120, %c0_121] : memref<128x128xbf16, #tpu.memory_space<vmem>>, vector<128x128xbf16>
    %cst_122 = arith.constant dense<0.000000e+00> : vector<8x128xf32>
    %225 = tpu.matmul %223, %224, %cst_122 {dimension_numbers = #tpu.dot_dimension_numbers<[1], [0], [0], [1], [0, 0, 1, 1], [], []>} : vector<8x128xbf16>, vector<128x128xbf16>, vector<8x128xf32> -> vector<8x128xf32>
    %226 = arith.addf %225, %5 : vector<8x128xf32>
    %cst_123 = arith.constant 0.999999463 : f32
    %227 = vector.broadcast %cst_123 : f32 to vector<1x128xf32>
    %228 = arith.mulf %227, %1 : vector<1x128xf32>
    %229 = vector.broadcast %228 : vector<1x128xf32> to vector<8x128xf32>
    %230 = arith.addf %226, %229 : vector<8x128xf32>
    %231 = math.tanh %230 : vector<8x128xf32>
    %232 = arith.truncf %231 : vector<8x128xf32> to vector<8x128xbf16>
    %c0_124 = arith.constant 0 : index
    %c0_125 = arith.constant 0 : index
    %233 = vector.load %arg5[%c0_124, %c0_125] : memref<128x128xbf16, #tpu.memory_space<vmem>>, vector<128x128xbf16>
    %cst_126 = arith.constant dense<0.000000e+00> : vector<8x128xf32>
    %234 = tpu.matmul %232, %233, %cst_126 {dimension_numbers = #tpu.dot_dimension_numbers<[1], [0], [0], [1], [0, 0, 1, 1], [], []>} : vector<8x128xbf16>, vector<128x128xbf16>, vector<8x128xf32> -> vector<8x128xf32>
    %cst_127 = arith.constant 1.00000048 : f32
    %235 = vector.broadcast %cst_127 : f32 to vector<8x128xf32>
    %236 = arith.mulf %235, %222 : vector<8x128xf32>
    %cst_128 = arith.constant 0.00100661803 : f32
    %237 = vector.broadcast %cst_128 : f32 to vector<8x128xf32>
    %238 = arith.mulf %237, %234 : vector<8x128xf32>
    %239 = arith.subf %236, %238 : vector<8x128xf32>
    %cst_129 = arith.constant -1.000000e+00 : f32
    %cst_130 = arith.constant 1.000000e+00 : f32
    %240 = vector.broadcast %cst_129 : f32 to vector<8x128xf32>
    %241 = arith.maximumf %240, %239 : vector<8x128xf32>
    %242 = vector.broadcast %cst_130 : f32 to vector<8x128xf32>
    %243 = arith.minimumf %242, %241 : vector<8x128xf32>
    %cst_131 = arith.constant 0.986895084 : f32
    %244 = vector.broadcast %cst_131 : f32 to vector<8x128xf32>
    %245 = arith.mulf %244, %243 : vector<8x128xf32>
    %cst_132 = arith.constant 0.000000e+00 : f32
    %246 = vector.broadcast %cst_132 : f32 to vector<8x128xf32>
    %247 = arith.mulf %246, %222 : vector<8x128xf32>
    %248 = arith.addf %245, %247 : vector<8x128xf32>
    %c7 = arith.constant 7 : index
    %c0_133 = arith.constant 0 : index
    %c0_134 = arith.constant 0 : index
    %249 = vector.load %arg2[%c7, %c0_133, %c0_134] : memref<8x8x128xf32, #tpu.memory_space<vmem>>, vector<1x8x128xf32>
    %250 = vector.shape_cast %249 : vector<1x8x128xf32> to vector<8x128xf32>
    %cst_135 = arith.constant 0.000000e+00 : f32
    %251 = vector.broadcast %cst_135 : f32 to vector<8x128xf32>
    %252 = arith.mulf %250, %251 : vector<8x128xf32>
    %253 = arith.addf %248, %252 : vector<8x128xf32>
    %c0_136 = arith.constant 0 : index
    %c0_137 = arith.constant 0 : index
    %254 = vector.load %arg7[%c0_136, %c0_137] : memref<8x128xf32, #tpu.memory_space<vmem>>, vector<8x128xf32>
    tpu.vector_store %arg7[%c0_136, %c0_137], %253 {strides = array<i32>} : memref<8x128xf32, #tpu.memory_space<vmem>>, vector<8x128xf32>,
    return
  }
}

</mosaic_0001>

<bundles_post_ra>
// kernel: tpu_custom_call.1
= control target key start
LH: loop header
LB: loop body
LE: loop exit
PB: predicated region body
PF: predicated region fallthrough
CT: control target
= control target key end

     0   :  { %12 = vsyncpa [#allocation3], 0  ;;  %s1317_s0 = inlined_call_operand.hbm [shape: f32[8,128], index: 0, kind: input, shape index: {}]   ;;  %s1318_s1 = inlined_call_operand.hbm [shape: f32[8,128], index: 1, kind: input, shape index: {}]   ;;  %s1319_s2 = inlined_call_operand.hbm [shape: f32[8,8,128], index: 2, kind: input, shape index: {}]   ;;  %s1320_s3 = inlined_call_operand.hbm [shape: bf16[128,128], index: 3, kind: input, shape index: {}]   ;;  %s1321_s4 = inlined_call_operand.hbm [shape: bf16[128,128], index: 4, kind: input, shape index: {}]   ;;  %s1322_s5 = inlined_call_operand.hbm [shape: bf16[128,128], index: 5, kind: input, shape index: {}]   ;;  %s1323_s6 = inlined_call_operand.vmem [shape: f32[1,128], index: 6, kind: input, shape index: {}]   ;;  %s1324_s7 = inlined_call_operand.hbm [shape: f32[8,128], index: 7, kind: output, shape index: {}]  }
   0x1   :  { %13 = vsyncpa [#allocation6], 0 }
   0x2   :  { %14 = vsyncpa [#allocation9], 0 }
   0x3   :  { %15 = vsyncpa [#allocation12], 0  ;;  %s33_s26 = sshll.u32 %s1318_s1, 4  ;;  %s34_s26 = int_to_ptr.hbm [resolvable:$true] %s33_s26 }
   0x4   :  { %16 = vsyncpa [#allocation4], 0  ;;  %s1047_s27 = smov [#allocation5]   ;;  %s56_s8 = sshll.u32 %s1320_s3, 4  ;;  %s57_s8 = int_to_ptr.hbm [resolvable:$true] %s56_s8 }
   0x5   :  { %s35_s28 = sshll.u32 %s1047_s27, 4  ;;  %s1048_s9 = smov [#allocation8]   ;;  %s36_s28 = int_to_ptr.vmem [resolvable:$true] %s35_s28 }
   0x6   :  { %38 = dma.hbm_to_vmem [thread:$0]  %s34_s26, 128, %s36_s28, [#allocation6]  }
   0x7   :  { %s58_s10 = sshll.u32 %s1048_s9, 4  ;;  %s1049_s11 = smov 64   ;;  %s59_s10 = int_to_ptr.vmem [resolvable:$true] %s58_s10 }
   0x8   :  { %s1050_s12 = smov 4   ;;  %s22_s14 = sshll.u32 %s1317_s0, 4  ;;  %s23_s14 = int_to_ptr.hbm [resolvable:$true] %s22_s14 }
   0x9   :  { %64 = dma.hbm_to_vmem [thread:$0]  %s57_s8, 1024, %s59_s10, [#allocation9], %s1049_s11, %s1049_s11, %s1050_s12  }
   0xa   :  { %s1051_s15 = smov [#allocation2]   ;;  %s43_s18 = sshll.u32 %s1319_s2, 4  ;;  %s44_s18 = int_to_ptr.hbm [resolvable:$true] %s43_s18 }
   0xb   :  { %s24_s16 = sshll.u32 %s1051_s15, 4  ;;  %s1052_s19 = smov [#allocation7]   ;;  %s25_s16 = int_to_ptr.vmem [resolvable:$true] %s24_s16 }
   0xc   :  { %27 = dma.hbm_to_vmem [thread:$0]  %s23_s14, 128, %s25_s16, [#allocation3]  }
   0xd   :  { %s45_s20 = sshll.u32 %s1052_s19, 4  ;;  %s1053_s21 = smov 128   ;;  %s46_s20 = int_to_ptr.vmem [resolvable:$true] %s45_s20 }
   0xe   :  { %s1054_s22 = smov 8   ;;  %s69_s0 = sshll.u32 %s1321_s4, 4  ;;  %s70_s0 = int_to_ptr.hbm [resolvable:$true] %s69_s0 }
   0xf   :  { %51 = dma.hbm_to_vmem [thread:$0]  %s44_s18, 1024, %s46_s20, [#allocation6], %s1053_s21, %s1053_s21, %s1054_s22  }
  0x10   :  { %s1055_s25 = smov [#allocation10]   ;;  %s82_s2 = sshll.u32 %s1322_s5, 4  ;;  %s83_s2 = int_to_ptr.hbm [resolvable:$true] %s82_s2 }
  0x11   :  { %s71_s26 = sshll.u32 %s1055_s25, 4  ;;  %s1056_s29 = smov [#allocation11]   ;;  %s72_s26 = int_to_ptr.vmem [resolvable:$true] %s71_s26 }
  0x12   :  { %77 = dma.hbm_to_vmem [thread:$0]  %s70_s0, 1024, %s72_s26, [#allocation9], %s1049_s11, %s1049_s11, %s1050_s12  }
  0x13   :  { %s84_s30 = sshll.u32 %s1056_s29, 4  ;;  %s85_s30 = int_to_ptr.vmem [resolvable:$true] %s84_s30 }
  0x14   :  { %90 = dma.hbm_to_vmem [thread:$0]  %s83_s2, 1024, %s85_s30, [#allocation12], %s1049_s11, %s1049_s11, %s1050_s12  }
  0x15   :  { %1037 = dma.done.wait [#allocation3], 128  }
  0x16   :  { %1038 = vsyncadd [#allocation3], 4294967168 }
  0x17   :  { %1039 = dma.done.wait [#allocation6], 1152  }
  0x18   :  { %1040 = vsyncadd [#allocation6], 4294966144 }
  0x19   :  { %1041 = dma.done.wait [#allocation9], 2048  }
  0x1a   :  { %1042 = vsyncadd [#allocation9], 4294965248 }
  0x1b   :  { %1043 = dma.done.wait [#allocation12], 1024  }
  0x1c   :  { %1044 = vsyncadd [#allocation12], 4294966272  ;;  %v825_v0 = vld [vmem:[#allocation10 + $0x38] sm:$0xff]  ;;  %v824_v2 = vld [vmem:[#allocation10 + $0x30] sm:$0xff]  ;;  %s701_s11 = sshll.u32 %s1324_s7, 4  ;;  %s702_s11 = int_to_ptr.hbm [resolvable:$true] %s701_s11 }
  0x1d   :  { %v1125_v1 = vld [vmem:[#allocation8 + $0x38] sm:$0xff]  ;;  %185 = vmatpush.bf16.msra.mxu0 %v825_v0  ;;  %v1128_v3 = vld [vmem:[#allocation8 + $0x30] sm:$0xff]  ;;  %v823_v4 = vld [vmem:[#allocation10 + $0x28] sm:$0xff] }
  0x1e   :  { %263 = vmatpush.bf16.msra.mxu1 %v1125_v1  ;;  %372 = vmatpush.bf16.msra.mxu3 %v1125_v1  ;;  %v1132_v5 = vld [vmem:[#allocation8 + $0x28] sm:$0xff]  ;;  %v1134_v6 = vld [vmem:[#allocation11 + $0x38] sm:$0xff]  ;;  %v1138_v7 = vld [vmem:[#allocation11 + $0x30] sm:$0xff] }
  0x1f   :  { %347 = vmatpush.bf16.msra.mxu2 %v1134_v6  ;;  %v822_v8 = vld [vmem:[#allocation10 + $0x20] sm:$0xff]  ;;  %v1145_v10 = vld [vmem:[#allocation11 + $0x28] sm:$0xff]  ;;  %v821_v11 = vld [vmem:[#allocation10 + $0x18] sm:$0xff] }
  0x20   :  { %v1141_v9 = vld [vmem:[#allocation8 + $0x20] sm:$0xff]  ;;  %v1148_v12 = vld [vmem:[#allocation8 + $0x18] sm:$0xff]  ;;  %v820_v14 = vld [vmem:[#allocation10 + $0x10] sm:$0xff] }
  0x21   :  { %186 = vmatpush.bf16.msra.mxu0 %v824_v2  ;;  %v1152_v13 = vld [vmem:[#allocation11 + $0x20] sm:$0xff]  ;;  %v1155_v15 = vld [vmem:[#allocation8 + $0x10] sm:$0xff]  ;;  %v1159_v16 = vld [vmem:[#allocation11 + $0x18] sm:$0xff] }
  0x22   :  { %264 = vmatpush.bf16.msra.mxu1 %v1128_v3  ;;  %373 = vmatpush.bf16.msra.mxu3 %v1128_v3  ;;  %v819_v17 = vld [vmem:[#allocation10 + $0x8] sm:$0xff]  ;;  %v818_v19 = vld [vmem:[#allocation10] sm:$0xff]  ;;  %v119_v21 = vld [vmem:[#allocation5] sm:$0xff] }
  0x23   :  { %348 = vmatpush.bf16.msra.mxu2 %v1138_v7  ;;  %v1162_v18 = vld [vmem:[#allocation8 + $0x8] sm:$0xff]  ;;  %v1167_v20 = vld [vmem:[#allocation8] sm:$0xff]  ;;  %v1169_v22 = vld [vmem:[#allocation2] sm:$0xff]  ;;  %v120_v23 = vpack.c.bf16 %v119_v21, %v119_v21 }
  0x24   :  { %v198_v24 = vpack.c.bf16 %v1169_v22, %v1169_v22  ;;  %v1205_v25 = vld [vmem:[#allocation11 + $0x10] sm:$0xff]  ;;  %v1209_v26 = vld [vmem:[#allocation11 + $0x8] sm:$0xff]  ;;  %v1213_v27 = vld [vmem:[#allocation11] sm:$0xff]  ;;  %v360_v39 = vmul.f32 3.3519914, %v1169_v22 }
  0x25   :  { %187 = vmatpush.bf16.msra.mxu0 %v823_v4  ;;  %v1226_v28 = vld [vmem:[%s1323_s6] sm:$0x1]  ;;  %v368_v43 = vld [vmem:[#allocation7] sm:$0xff]  ;;  %v366_v44 = vmul.f32 0.038180504, %v1169_v22  ;;  %v414_v0 = vld [vmem:[#allocation7 + $0x8] sm:$0xff] }
  0x26   :  { %265 = vmatpush.bf16.msra.mxu1 %v1132_v5  ;;  %374 = vmatpush.bf16.msra.mxu3 %v1132_v5  ;;  %v276_v29 = vmul.f32 0.29833013, %v1226_v28  ;;  %v369_v47 = vmul.f32 0.32964164, %v368_v43  ;;  %v385_v52 = vmul.f32 0.9434026, %v1226_v28 }
  0x27   :  { %349 = vmatpush.bf16.msra.mxu2 %v1145_v10  ;;  %v431_v22 = vmul.f32 0.99443364, %v1226_v28  ;;  %s1057_s6 = smov [#allocation13]  }
  0x28   :  { %v278_v30 = vperm.slane %v276_v29, 0  ;;  %v387_v53 = vperm.slane %v385_v52, 0  ;;  %s699_s8 = sshll.u32 %s1057_s6, 4  ;;  %s700_s8 = int_to_ptr.vmem [resolvable:$true] %s699_s8 }
  0x29   :  { %188 = vmatpush.bf16.msra.mxu0 %v822_v8 }
  0x2a   :  { %266 = vmatpush.bf16.msra.mxu1 %v1141_v9  ;;  %375 = vmatpush.bf16.msra.mxu3 %v1141_v9 }
  0x2b   :  { %350 = vmatpush.bf16.msra.mxu2 %v1152_v13 }
  0x2d   :  { %189 = vmatpush.bf16.msra.mxu0 %v821_v11  ;;  %v415_v11 = vmul.f32 0.10046542, %v414_v0 }
  0x2e   :  { %267 = vmatpush.bf16.msra.mxu1 %v1148_v12  ;;  %376 = vmatpush.bf16.msra.mxu3 %v1148_v12 }
  0x2f   :  { %351 = vmatpush.bf16.msra.mxu2 %v1159_v16 }
  0x31   :  { %190 = vmatpush.bf16.msra.mxu0 %v820_v14 }
  0x32   :  { %268 = vmatpush.bf16.msra.mxu1 %v1155_v15  ;;  %377 = vmatpush.bf16.msra.mxu3 %v1155_v15 }
  0x33   :  { %352 = vmatpush.bf16.msra.mxu2 %v1205_v25 }
  0x35   :  { %191 = vmatpush.bf16.msra.mxu0 %v819_v17 }
  0x36   :  { %269 = vmatpush.bf16.msra.mxu1 %v1162_v18  ;;  %378 = vmatpush.bf16.msra.mxu3 %v1162_v18 }
  0x37   :  { %353 = vmatpush.bf16.msra.mxu2 %v1209_v26 }
  0x39   :  { %192 = vmatpush.bf16.msra.mxu0 %v818_v19 }
  0x3a   :  { %270 = vmatpush.bf16.msra.mxu1 %v1167_v20  ;;  %379 = vmatpush.bf16.msra.mxu3 %v1167_v20 }
  0x3b   :  { %354 = vmatpush.bf16.msra.mxu2 %v1213_v27 }
  0x3c   :  { %193 = vmatmul.bf16.vlgmr.msra.gmra.mxu0 %v120_v23  ;;  %v433_v23 = vperm.slane %v431_v22, 0 }
  0x3d   :  { %392 = vmatpush.bf16.msrb.mxu0 %v1134_v6  ;;  %271 = vmatmul.bf16.vlgmr.msra.gmra.mxu1 %v198_v24 }
  0x3e   :  { %418 = vmatpush.bf16.msrb.mxu1 %v1125_v1  ;;  %464 = vmatpush.bf16.msrb.mxu3 %v1125_v1 }
  0x3f   :  { %438 = vmatpush.bf16.msrb.mxu2 %v1134_v6 }
  0x41   :  { %393 = vmatpush.bf16.msrb.mxu0 %v1138_v7 }
  0x42   :  { %419 = vmatpush.bf16.msrb.mxu1 %v1128_v3  ;;  %465 = vmatpush.bf16.msrb.mxu3 %v1128_v3 }
  0x43   :  { %439 = vmatpush.bf16.msrb.mxu2 %v1138_v7 }
  0x45   :  { %394 = vmatpush.bf16.msrb.mxu0 %v1145_v10 }
  0x46   :  { %420 = vmatpush.bf16.msrb.mxu1 %v1132_v5  ;;  %466 = vmatpush.bf16.msrb.mxu3 %v1132_v5 }
  0x47   :  { %440 = vmatpush.bf16.msrb.mxu2 %v1145_v10 }
  0x49   :  { %395 = vmatpush.bf16.msrb.mxu0 %v1152_v13 }
  0x4a   :  { %421 = vmatpush.bf16.msrb.mxu1 %v1141_v9  ;;  %467 = vmatpush.bf16.msrb.mxu3 %v1141_v9 }
  0x4b   :  { %441 = vmatpush.bf16.msrb.mxu2 %v1152_v13 }
  0x4d   :  { %396 = vmatpush.bf16.msrb.mxu0 %v1159_v16 }
  0x4e   :  { %422 = vmatpush.bf16.msrb.mxu1 %v1148_v12  ;;  %468 = vmatpush.bf16.msrb.mxu3 %v1148_v12 }
  0x4f   :  { %442 = vmatpush.bf16.msrb.mxu2 %v1159_v16 }
  0x51   :  { %397 = vmatpush.bf16.msrb.mxu0 %v1205_v25 }
  0x52   :  { %423 = vmatpush.bf16.msrb.mxu1 %v1155_v15  ;;  %469 = vmatpush.bf16.msrb.mxu3 %v1155_v15 }
  0x53   :  { %443 = vmatpush.bf16.msrb.mxu2 %v1205_v25 }
  0x55   :  { %398 = vmatpush.bf16.msrb.mxu0 %v1209_v26 }
  0x56   :  { %424 = vmatpush.bf16.msrb.mxu1 %v1162_v18  ;;  %470 = vmatpush.bf16.msrb.mxu3 %v1162_v18 }
  0x57   :  { %444 = vmatpush.bf16.msrb.mxu2 %v1209_v26 }
  0x59   :  { %399 = vmatpush.bf16.msrb.mxu0 %v1213_v27 }
  0x5a   :  { %425 = vmatpush.bf16.msrb.mxu1 %v1167_v20  ;;  %471 = vmatpush.bf16.msrb.mxu3 %v1167_v20 }
  0x5b   :  { %445 = vmatpush.bf16.msrb.mxu2 %v1213_v27 }
  0x5d   :  { %484 = vmatpush.bf16.msra.mxu0 %v1134_v6 }
  0x5e   :  { %510 = vmatpush.bf16.msra.mxu1 %v1125_v1 }
  0x61   :  { %485 = vmatpush.bf16.msra.mxu0 %v1138_v7 }
  0x62   :  { %511 = vmatpush.bf16.msra.mxu1 %v1128_v3 }
  0x65   :  { %486 = vmatpush.bf16.msra.mxu0 %v1145_v10 }
  0x66   :  { %512 = vmatpush.bf16.msra.mxu1 %v1132_v5 }
  0x69   :  { %487 = vmatpush.bf16.msra.mxu0 %v1152_v13 }
  0x6a   :  { %513 = vmatpush.bf16.msra.mxu1 %v1141_v9 }
  0x6d   :  { %488 = vmatpush.bf16.msra.mxu0 %v1159_v16 }
  0x6e   :  { %514 = vmatpush.bf16.msra.mxu1 %v1148_v12 }
  0x71   :  { %489 = vmatpush.bf16.msra.mxu0 %v1205_v25 }
  0x72   :  { %515 = vmatpush.bf16.msra.mxu1 %v1155_v15 }
  0x75   :  { %490 = vmatpush.bf16.msra.mxu0 %v1209_v26 }
  0x76   :  { %516 = vmatpush.bf16.msra.mxu1 %v1162_v18 }
  0x79   :  { %491 = vmatpush.bf16.msra.mxu0 %v1213_v27 }
  0x7a   :  { %517 = vmatpush.bf16.msra.mxu1 %v1167_v20 }
  0xb9   :  { %v1233_v31 = vpop.f32.mrf.mxu0 }
  0xba   :  { %v272_v32 = vpop.f32.mrf.mxu1 }
  0xbb   :  { %v273_v33 = vadd.f32 %v272_v32, %v1233_v31 }
  0xbd   :  { %v280_v34 = vadd.f32 %v278_v30, %v273_v33 }
  0xbf   :  { %853 = vtanh.f32 %v280_v34 }
  0xc1   :  { %v196_v35 = vpop.f32.mrf.mxu0 }
  0xc2   :  { %v274_v36 = vpop.f32.mrf.mxu1 }
  0xc5   :  { %v854_v37 = vpop.eup %853 }
  0xc6   :  { %v282_v38 = vpack.c.bf16 %v854_v37, %v854_v37 }
  0xc8   :  { %355 = vmatmul.bf16.vlgmr.msra.gmra.mxu2 %v282_v38 }
  0xc9   :  { %530 = vmatpush.bf16.msra.mxu2 %v1134_v6 }
  0xcd   :  { %531 = vmatpush.bf16.msra.mxu2 %v1138_v7 }
  0xd1   :  { %532 = vmatpush.bf16.msra.mxu2 %v1145_v10 }
  0xd5   :  { %533 = vmatpush.bf16.msra.mxu2 %v1152_v13 }
  0xd9   :  { %534 = vmatpush.bf16.msra.mxu2 %v1159_v16 }
  0xdd   :  { %535 = vmatpush.bf16.msra.mxu2 %v1205_v25 }
  0xe1   :  { %536 = vmatpush.bf16.msra.mxu2 %v1209_v26 }
  0xe5   :  { %537 = vmatpush.bf16.msra.mxu2 %v1213_v27 }
 0x14b   :  { %v356_v40 = vpop.f32.mrf.mxu2 }
 0x14c   :  { %v361_v41 = vmul.f32 3.199351, %v356_v40 }
 0x14e   :  { %v362_v42 = vsub.f32 %v360_v39, %v361_v41  ;;  %v460_v39 = vld [vmem:[#allocation7 + $0x10] sm:$0xff] }
 0x14f   :  { %v461_v43 = vmul.f32 0.031662058, %v460_v39 }
 0x150   :  { %v810_v45 = vclamps-f32 %v362_v42, 1.0 }
 0x152   :  { %v365_v46 = vmul.f32 0.93201226, %v810_v45 }
 0x153   :  { %v358_v48 = vpop.f32.mrf.mxu2 }
 0x154   :  { %v367_v49 = vadd.f32 %v366_v44, %v365_v46  ;;  %v477_v48 = vmul.f32 0.99944335, %v1226_v28 }
 0x156   :  { %v370_v50 = vadd.f32 %v369_v47, %v367_v49  ;;  %v479_v49 = vperm.slane %v477_v48, 0 }
 0x158   :  { %v371_v51 = vpack.c.bf16 %v370_v50, %v370_v50  ;;  %v405_v61 = vmul.f32 1.0599929, %v370_v50  ;;  %v411_v8 = vmul.f32 0.09575344, %v370_v50 }
 0x15a   :  { %380 = vmatmul.bf16.vlgmr.msra.gmra.mxu3 %v371_v51 }
 0x15b   :  { %556 = vmatpush.bf16.msra.mxu3 %v1125_v1 }
 0x15f   :  { %557 = vmatpush.bf16.msra.mxu3 %v1128_v3 }
 0x163   :  { %558 = vmatpush.bf16.msra.mxu3 %v1132_v5 }
 0x167   :  { %559 = vmatpush.bf16.msra.mxu3 %v1141_v9 }
 0x16b   :  { %560 = vmatpush.bf16.msra.mxu3 %v1148_v12 }
 0x16f   :  { %561 = vmatpush.bf16.msra.mxu3 %v1155_v15 }
 0x173   :  { %562 = vmatpush.bf16.msra.mxu3 %v1162_v18 }
 0x177   :  { %563 = vmatpush.bf16.msra.mxu3 %v1167_v20 }
 0x1dd   :  { %v381_v54 = vpop.f32.mrf.mxu3 }
 0x1de   :  { %v382_v55 = vadd.f32 %v381_v54, %v1233_v31 }
 0x1e0   :  { %v389_v56 = vadd.f32 %v387_v53, %v382_v55 }
 0x1e2   :  { %855 = vtanh.f32 %v389_v56 }
 0x1e5   :  { %v383_v57 = vpop.f32.mrf.mxu3 }
 0x1e8   :  { %v856_v58 = vpop.eup %855 }
 0x1e9   :  { %v391_v59 = vpack.c.bf16 %v856_v58, %v856_v58 }
 0x1eb   :  { %400 = vmatmul.bf16.vlgmr.msrb.gmra.mxu0 %v391_v59 }
 0x1ec   :  { %576 = vmatpush.bf16.msrb.mxu0 %v1134_v6 }
 0x1f0   :  { %577 = vmatpush.bf16.msrb.mxu0 %v1138_v7 }
 0x1f4   :  { %578 = vmatpush.bf16.msrb.mxu0 %v1145_v10 }
 0x1f8   :  { %579 = vmatpush.bf16.msrb.mxu0 %v1152_v13 }
 0x1fc   :  { %580 = vmatpush.bf16.msrb.mxu0 %v1159_v16 }
 0x200   :  { %581 = vmatpush.bf16.msrb.mxu0 %v1205_v25 }
 0x204   :  { %582 = vmatpush.bf16.msrb.mxu0 %v1209_v26 }
 0x208   :  { %583 = vmatpush.bf16.msrb.mxu0 %v1213_v27 }
 0x268   :  { %v401_v60 = vpop.f32.mrf.mxu0 }
 0x269   :  { %v406_v62 = vmul.f32 0.35154647, %v401_v60 }
 0x26b   :  { %v407_v63 = vsub.f32 %v405_v61, %v406_v62 }
 0x26d   :  { %v811_v2 = vclamps-f32 %v407_v63, 1.0 }
 0x26f   :  { %v410_v4 = vmul.f32 0.9040996, %v811_v2  ;;  %v552_v2 = vld [vmem:[#allocation7 + $0x20] sm:$0xff] }
 0x270   :  { %v403_v14 = vpop.f32.mrf.mxu0 }
 0x271   :  { %v412_v17 = vadd.f32 %v411_v8, %v410_v4  ;;  %v553_v14 = vmul.f32 0.0033977258, %v552_v2 }
 0x273   :  { %v416_v19 = vadd.f32 %v415_v11, %v412_v17 }
 0x275   :  { %v417_v21 = vpack.c.bf16 %v416_v19, %v416_v19  ;;  %v451_v36 = vmul.f32 1.0055976, %v416_v19  ;;  %v457_v42 = vmul.f32 0.09974607, %v416_v19 }
 0x277   :  { %426 = vmatmul.bf16.vlgmr.msrb.gmra.mxu1 %v417_v21 }
 0x278   :  { %602 = vmatpush.bf16.msrb.mxu1 %v1125_v1 }
 0x27c   :  { %603 = vmatpush.bf16.msrb.mxu1 %v1128_v3 }
 0x280   :  { %604 = vmatpush.bf16.msrb.mxu1 %v1132_v5 }
 0x284   :  { %605 = vmatpush.bf16.msrb.mxu1 %v1141_v9 }
 0x288   :  { %606 = vmatpush.bf16.msrb.mxu1 %v1148_v12 }
 0x28c   :  { %607 = vmatpush.bf16.msrb.mxu1 %v1155_v15 }
 0x290   :  { %608 = vmatpush.bf16.msrb.mxu1 %v1162_v18 }
 0x294   :  { %609 = vmatpush.bf16.msrb.mxu1 %v1167_v20 }
 0x2f4   :  { %v427_v24 = vpop.f32.mrf.mxu1 }
 0x2f5   :  { %v428_v29 = vadd.f32 %v427_v24, %v1233_v31 }
 0x2f7   :  { %v435_v30 = vadd.f32 %v433_v23, %v428_v29  ;;  %v569_v23 = vmul.f32 0.99999344, %v1226_v28 }
 0x2f9   :  { %857 = vtanh.f32 %v435_v30  ;;  %v571_v24 = vperm.slane %v569_v23, 0 }
 0x2fc   :  { %v429_v32 = vpop.f32.mrf.mxu1 }
 0x2ff   :  { %v858_v33 = vpop.eup %857 }
 0x300   :  { %v437_v34 = vpack.c.bf16 %v858_v33, %v858_v33 }
 0x302   :  { %446 = vmatmul.bf16.vlgmr.msrb.gmra.mxu2 %v437_v34 }
 0x303   :  { %622 = vmatpush.bf16.msrb.mxu2 %v1134_v6 }
 0x307   :  { %623 = vmatpush.bf16.msrb.mxu2 %v1138_v7 }
 0x30b   :  { %624 = vmatpush.bf16.msrb.mxu2 %v1145_v10 }
 0x30f   :  { %625 = vmatpush.bf16.msrb.mxu2 %v1152_v13 }
 0x313   :  { %626 = vmatpush.bf16.msrb.mxu2 %v1159_v16 }
 0x317   :  { %627 = vmatpush.bf16.msrb.mxu2 %v1205_v25 }
 0x31b   :  { %628 = vmatpush.bf16.msrb.mxu2 %v1209_v26 }
 0x31f   :  { %629 = vmatpush.bf16.msrb.mxu2 %v1213_v27 }
 0x385   :  { %v447_v35 = vpop.f32.mrf.mxu2 }
 0x386   :  { %v452_v37 = vmul.f32 0.10595478, %v447_v35 }
 0x388   :  { %v453_v38 = vsub.f32 %v451_v36, %v452_v37 }
 0x38a   :  { %v812_v40 = vclamps-f32 %v453_v38, 1.0 }
 0x38c   :  { %v456_v41 = vmul.f32 0.90025485, %v812_v40  ;;  %v598_v40 = vld [vmem:[#allocation7 + $0x28] sm:$0xff] }
 0x38d   :  { %v449_v44 = vpop.f32.mrf.mxu2 }
 0x38e   :  { %v458_v45 = vadd.f32 %v457_v42, %v456_v41  ;;  %v599_v44 = vmul.f32 0.0015260295, %v598_v40 }
 0x390   :  { %v462_v46 = vadd.f32 %v461_v43, %v458_v45 }
 0x392   :  { %v463_v47 = vpack.c.bf16 %v462_v46, %v462_v46 }
 0x394   :  { %472 = vmatmul.bf16.vlgmr.msrb.gmra.mxu3 %v463_v47 }
 0x395   :  { %648 = vmatpush.bf16.msrb.mxu3 %v1125_v1 }
 0x399   :  { %649 = vmatpush.bf16.msrb.mxu3 %v1128_v3 }
 0x39d   :  { %650 = vmatpush.bf16.msrb.mxu3 %v1132_v5 }
 0x3a1   :  { %651 = vmatpush.bf16.msrb.mxu3 %v1141_v9 }
 0x3a5   :  { %652 = vmatpush.bf16.msrb.mxu3 %v1148_v12  ;;  %v497_v12 = vmul.f32 1.000557, %v462_v46 }
 0x3a9   :  { %653 = vmatpush.bf16.msrb.mxu3 %v1155_v15 }
 0x3ad   :  { %654 = vmatpush.bf16.msrb.mxu3 %v1162_v18 }
 0x3b1   :  { %655 = vmatpush.bf16.msrb.mxu3 %v1167_v20  ;;  %v506_v20 = vld [vmem:[#allocation7 + $0x18] sm:$0xff] }
 0x3b2   :  { %v507_v54 = vmul.f32 0.0100794835, %v506_v20 }
 0x417   :  { %v473_v50 = vpop.f32.mrf.mxu3 }
 0x418   :  { %v474_v1 = vadd.f32 %v473_v50, %v1233_v31 }
 0x41a   :  { %v481_v51 = vadd.f32 %v479_v49, %v474_v1  ;;  %v615_v49 = vmul.f32 0.99999845, %v1226_v28 }
 0x41c   :  { %859 = vtanh.f32 %v481_v51  ;;  %v617_v50 = vperm.slane %v615_v49, 0 }
 0x41f   :  { %v475_v3 = vpop.f32.mrf.mxu3 }
 0x422   :  { %v860_v5 = vpop.eup %859 }
 0x423   :  { %v483_v52 = vpack.c.bf16 %v860_v5, %v860_v5 }
 0x425   :  { %492 = vmatmul.bf16.vlgmr.msra.gmra.mxu0 %v483_v52 }
 0x426   :  { %668 = vmatpush.bf16.msra.mxu0 %v1134_v6 }
 0x42a   :  { %669 = vmatpush.bf16.msra.mxu0 %v1138_v7  ;;  %v503_v7 = vmul.f32 0.10154516, %v462_v46 }
 0x42e   :  { %670 = vmatpush.bf16.msra.mxu0 %v1145_v10 }
 0x432   :  { %671 = vmatpush.bf16.msra.mxu0 %v1152_v13 }
 0x436   :  { %672 = vmatpush.bf16.msra.mxu0 %v1159_v16  ;;  %v523_v16 = vmul.f32 0.99994344, %v1226_v28 }
 0x43a   :  { %673 = vmatpush.bf16.msra.mxu0 %v1205_v25  ;;  %v525_v25 = vperm.slane %v523_v16, 0 }
 0x43e   :  { %674 = vmatpush.bf16.msra.mxu0 %v1209_v26 }
 0x442   :  { %675 = vmatpush.bf16.msra.mxu0 %v1213_v27 }
 0x4a2   :  { %v493_v9 = vpop.f32.mrf.mxu0 }
 0x4a3   :  { %v498_v15 = vmul.f32 0.033379305, %v493_v9 }
 0x4a5   :  { %v499_v18 = vsub.f32 %v497_v12, %v498_v15 }
 0x4a7   :  { %v813_v6 = vclamps-f32 %v499_v18, 1.0 }
 0x4a9   :  { %v502_v53 = vmul.f32 0.8984719, %v813_v6  ;;  %v644_v6 = vld [vmem:[#allocation7 + $0x30] sm:$0xff] }
 0x4aa   :  { %v495_v10 = vpop.f32.mrf.mxu0 }
 0x4ab   :  { %v504_v55 = vadd.f32 %v503_v7, %v502_v53  ;;  %v645_v10 = vmul.f32 0.0008164965, %v644_v6 }
 0x4ad   :  { %v508_v13 = vadd.f32 %v507_v54, %v504_v55 }
 0x4af   :  { %v509_v56 = vpack.c.bf16 %v508_v13, %v508_v13  ;;  %v543_v62 = vmul.f32 1.0000565, %v508_v13  ;;  %v549_v11 = vmul.f32 0.11543967, %v508_v13 }
 0x4b1   :  { %518 = vmatmul.bf16.vlgmr.msra.gmra.mxu1 %v509_v56 }
 0x52e   :  { %v519_v26 = vpop.f32.mrf.mxu1 }
 0x52f   :  { %v520_v27 = vadd.f32 %v519_v26, %v1233_v31 }
 0x531   :  { %v527_v57 = vadd.f32 %v525_v25, %v520_v27  ;;  %v661_v25 = vmul.f32 0.99999946, %v1226_v28 }
 0x533   :  { %861 = vtanh.f32 %v527_v57  ;;  %v663_v26 = vperm.slane %v661_v25, 0 }
 0x536   :  { %v521_v58 = vpop.f32.mrf.mxu1 }
 0x539   :  { %v862_v59 = vpop.eup %861 }
 0x53a   :  { %v529_v60 = vpack.c.bf16 %v862_v59, %v862_v59 }
 0x53c   :  { %538 = vmatmul.bf16.vlgmr.msra.gmra.mxu2 %v529_v60 }
 0x5bf   :  { %v539_v61 = vpop.f32.mrf.mxu2 }
 0x5c0   :  { %v544_v63 = vmul.f32 0.010634039, %v539_v61 }
 0x5c2   :  { %v545_v0 = vsub.f32 %v543_v62, %v544_v63 }
 0x5c4   :  { %v814_v4 = vclamps-f32 %v545_v0, 1.0 }
 0x5c6   :  { %v548_v8 = vmul.f32 0.884402, %v814_v4  ;;  %v690_v4 = vld [vmem:[#allocation7 + $0x38] sm:$0xff] }
 0x5c7   :  { %v541_v17 = vpop.f32.mrf.mxu2 }
 0x5c8   :  { %v550_v19 = vadd.f32 %v549_v11, %v548_v8  ;;  %v691_v17 = vmul.f32 0.0, %v690_v4 }
 0x5ca   :  { %v554_v21 = vadd.f32 %v553_v14, %v550_v19 }
 0x5cc   :  { %v555_v22 = vpack.c.bf16 %v554_v21, %v554_v21  ;;  %v589_v37 = vmul.f32 1.0000066, %v554_v21  ;;  %v595_v43 = vmul.f32 0.23287554, %v554_v21 }
 0x5ce   :  { %564 = vmatmul.bf16.vlgmr.msra.gmra.mxu3 %v555_v22 }
 0x651   :  { %v565_v29 = vpop.f32.mrf.mxu3 }
 0x652   :  { %v566_v30 = vadd.f32 %v565_v29, %v1233_v31 }
 0x654   :  { %v573_v32 = vadd.f32 %v571_v24, %v566_v30 }
 0x656   :  { %863 = vtanh.f32 %v573_v32 }
 0x659   :  { %v567_v33 = vpop.f32.mrf.mxu3 }
 0x65c   :  { %v864_v34 = vpop.eup %863 }
 0x65d   :  { %v575_v35 = vpack.c.bf16 %v864_v34, %v864_v34 }
 0x65f   :  { %584 = vmatmul.bf16.vlgmr.msrb.gmra.mxu0 %v575_v35 }
 0x6dc   :  { %v585_v36 = vpop.f32.mrf.mxu0 }
 0x6dd   :  { %v590_v38 = vmul.f32 0.0036129751, %v585_v36 }
 0x6df   :  { %v591_v39 = vsub.f32 %v589_v37, %v590_v38 }
 0x6e1   :  { %v815_v41 = vclamps-f32 %v591_v39, 1.0 }
 0x6e3   :  { %v594_v42 = vmul.f32 0.7660817, %v815_v41 }
 0x6e4   :  { %v587_v45 = vpop.f32.mrf.mxu0 }
 0x6e5   :  { %v596_v46 = vadd.f32 %v595_v43, %v594_v42 }
 0x6e7   :  { %v600_v47 = vadd.f32 %v599_v44, %v596_v46 }
 0x6e9   :  { %v601_v48 = vpack.c.bf16 %v600_v47, %v600_v47  ;;  %v635_v15 = vmul.f32 1.0000015, %v600_v47  ;;  %v641_v54 = vmul.f32 0.333333, %v600_v47 }
 0x6eb   :  { %610 = vmatmul.bf16.vlgmr.msrb.gmra.mxu1 %v601_v48 }
 0x768   :  { %v611_v1 = vpop.f32.mrf.mxu1 }
 0x769   :  { %v612_v51 = vadd.f32 %v611_v1, %v1233_v31 }
 0x76b   :  { %v619_v3 = vadd.f32 %v617_v50, %v612_v51 }
 0x76d   :  { %865 = vtanh.f32 %v619_v3 }
 0x770   :  { %v613_v5 = vpop.f32.mrf.mxu1 }
 0x773   :  { %v866_v52 = vpop.eup %865 }
 0x774   :  { %v621_v9 = vpack.c.bf16 %v866_v52, %v866_v52 }
 0x776   :  { %630 = vmatmul.bf16.vlgmr.msrb.gmra.mxu2 %v621_v9 }
 0x7f9   :  { %v631_v12 = vpop.f32.mrf.mxu2 }
 0x7fa   :  { %v636_v18 = vmul.f32 0.0017435155, %v631_v12 }
 0x7fc   :  { %v637_v20 = vsub.f32 %v635_v15, %v636_v18 }
 0x7fe   :  { %v816_v53 = vclamps-f32 %v637_v20, 1.0 }
 0x800   :  { %v640_v7 = vmul.f32 0.65792966, %v816_v53 }
 0x801   :  { %v633_v55 = vpop.f32.mrf.mxu2 }
 0x802   :  { %v642_v13 = vadd.f32 %v641_v54, %v640_v7 }
 0x804   :  { %v646_v56 = vadd.f32 %v645_v10, %v642_v13 }
 0x806   :  { %v647_v16 = vpack.c.bf16 %v646_v56, %v646_v56  ;;  %v681_v63 = vmul.f32 1.0000005, %v646_v56  ;;  %v687_v14 = vmul.f32 0.0, %v646_v56 }
 0x808   :  { %656 = vmatmul.bf16.vlgmr.msrb.gmra.mxu3 %v647_v16 }
 0x88b   :  { %v657_v27 = vpop.f32.mrf.mxu3 }
 0x88c   :  { %v658_v57 = vadd.f32 %v657_v27, %v1233_v31 }
 0x88e   :  { %v665_v58 = vadd.f32 %v663_v26, %v658_v57 }
 0x890   :  { %867 = vtanh.f32 %v665_v58 }
 0x893   :  { %v659_v59 = vpop.f32.mrf.mxu3 }
 0x896   :  { %v868_v60 = vpop.eup %867 }
 0x897   :  { %v667_v61 = vpack.c.bf16 %v868_v60, %v868_v60 }
 0x899   :  { %676 = vmatmul.bf16.vlgmr.msra.gmra.mxu0 %v667_v61 }
 0x916   :  { %v677_v62 = vpop.f32.mrf.mxu0 }
 0x917   :  { %v682_v0 = vmul.f32 0.001006618, %v677_v62 }
 0x919   :  { %v683_v2 = vsub.f32 %v681_v63, %v682_v0 }
 0x91b   :  { %v817_v8 = vclamps-f32 %v683_v2, 1.0 }
 0x91d   :  { %v686_v11 = vmul.f32 0.9868951, %v817_v8 }
 0x91e   :  { %v679_v28 = vpop.f32.mrf.mxu0 }
 0x91f   :  { %v688_v31 = vadd.f32 %v687_v14, %v686_v11 }
 0x921   :  { %v692_v19 = vadd.f32 %v691_v17, %v688_v31 }
 0x923   :  { %693 = vst [vmem:[#allocation13] sm:$0xff] %v692_v19 }
 0x924   :  { %704 = dma.vmem_to_hbm [thread:$0]  %s700_s8, 128, %s702_s11, [#allocation4]  }
 0x925   :  { %1045 = dma.done.wait [#allocation4], 128  }
 0x926   :  { %1046 = vsyncadd [#allocation4], 4294967168 }
 0x927   :  { %709 = vsyncpa [#allocation3], 1 }
 0x928   :  { %710 = vsyncpa [#allocation6], 1 }
 0x929   :  { %711 = vsyncpa [#allocation9], 1 }
 0x92a   :  { %712 = vsyncpa [#allocation12], 1 }
 0x92b   :  { %713 = vsyncpa [#allocation4], 1 }

</bundles_post_ra>
